<compile_context>
chip_gen: v7x
topology: tpu7x:2x2x1
jax: 0.10.0
libtpu: 0.0.40
codegen_flags: <defaults>
</compile_context>

<pallas_src>
import math

import jax
import jax.numpy as jnp
from jax import lax
from jax.experimental import pallas as pl
from jax.experimental.pallas import tpu as pltpu

_LANES = 128
_SUBLANES = 8
_TILE = _LANES * _SUBLANES          # 1024-element pad granule -> rows % 8 == 0
_MAX_BLOCK_ROWS = 4096              # (4096, 128) f32 block = 2 MiB
_VMEM_LIMIT_BYTES = 40 << 20        # explicit budget (safe on v5e/v6e/v7x)


def _cdiv(a, b):
    return (a + b - 1) // b


def _round_up(a, b):
    return _cdiv(a, b) * b


def _to_slab(x, pad_value):
    """Flatten row-major into a lane-dense (rows, 128) slab, rows % 8 == 0.

    Keeps the original dtype (cast happens in-kernel).  Pads (one copy) only
    when the element count is not a multiple of 1024; the pad value is chosen
    to be *neutral* for the reduction (0 for SSE, 1 for log), so no in-kernel
    mask is needed for it.
    """
    flat = jnp.reshape(x, (-1,))
    n = flat.shape[0]
    padded = _round_up(n, _TILE)
    if padded != n:
        flat = jnp.pad(flat, (0, padded - n), constant_values=pad_value)
    return flat.reshape(-1, _LANES)


def _plan(rows):
    """Block plan: big lane-dense blocks, 2-core leading axis only if useful."""
    block_rows = min(_MAX_BLOCK_ROWS, rows)       # rows is a multiple of 8
    num_blocks = _cdiv(rows, block_rows)
    ncores = 2 if num_blocks >= 2 else 1          # megacore split (v7x); serial elsewhere
    steps = _cdiv(num_blocks, ncores)
    return block_rows, num_blocks, ncores, steps


def _scalar_out_spec():
    # One (1, 1) SMEM scalar per core of the (ncores, 1) output.
    return pl.BlockSpec((1, 1), lambda c, i: (c, 0), memory_space=pltpu.SMEM)


# ---------------------------------------------------------------------------
# Kernels (built per call so static shape info is closed over)
# ---------------------------------------------------------------------------
def _make_sse_kernel(rows, block_rows, steps):
    num_blocks = _cdiv(rows, block_rows)
    last_blk = num_blocks - 1
    tail_rows = rows - last_blk * block_rows      # valid slab rows in last block
    has_tail = tail_rows != block_rows            # static
    groups = block_rows // _SUBLANES

    def kernel(xh_ref, tg_ref, sse_ref, csse_ref, acc_ref, cacc_ref):
        c = pl.program_id(0)
        i = pl.program_id(1)
        blk = c * steps + i

        @pl.when(i == 0)
        def _():
            acc_ref[...] = jnp.zeros_like(acc_ref)
            cacc_ref[...] = jnp.zeros_like(cacc_ref)

        def accumulate(valid_rows):
            xh = xh_ref[...].astype(jnp.float32)
            tg = tg_ref[...].astype(jnp.float32)
            d = xh - tg
            dc = jnp.clip(xh, 0.0, 1.0) - tg
            sq = d * d
            csq = dc * dc
            if valid_rows != block_rows:          # static: only the ragged tail block
                row = lax.broadcasted_iota(jnp.int32, (block_rows, _LANES), 0)
                keep = row < valid_rows
                sq = jnp.where(keep, sq, 0.0)
                csq = jnp.where(keep, csq, 0.0)
            # Sublane/lane-aligned partial sums into a single vreg (no XLU,
            # no full-block accumulator store traffic).
            acc_ref[...] += jnp.sum(sq.reshape(groups, _SUBLANES, _LANES), axis=0)
            cacc_ref[...] += jnp.sum(csq.reshape(groups, _SUBLANES, _LANES), axis=0)

        full_end = last_blk if has_tail else num_blocks

        @pl.when(blk < full_end)                  # steady state: no mask at all
        def _():
            accumulate(block_rows)

        if has_tail:
            @pl.when(blk == last_blk)             # single masked tail block
            def _():
                accumulate(tail_rows)

        # Duplicate clamped blocks (blk > last_blk) skip compute entirely.

        @pl.when(i == steps - 1)
        def _():
            sse_ref[0, 0] = jnp.sum(acc_ref[...])
            csse_ref[0, 0] = jnp.sum(cacc_ref[...])

    return kernel


def _make_logsum_kernel(rows, block_rows, steps):
    num_blocks = _cdiv(rows, block_rows)
    last_blk = num_blocks - 1
    tail_rows = rows - last_blk * block_rows
    has_tail = tail_rows != block_rows
    groups = block_rows // _SUBLANES

    def kernel(lk_ref, out_ref, acc_ref):
        c = pl.program_id(0)
        i = pl.program_id(1)
        blk = c * steps + i

        @pl.when(i == 0)
        def _():
            acc_ref[...] = jnp.zeros_like(acc_ref)

        def accumulate(valid_rows):
            lg = jnp.log(lk_ref[...].astype(jnp.float32))
            if valid_rows != block_rows:          # static: only the ragged tail block
                row = lax.broadcasted_iota(jnp.int32, (block_rows, _LANES), 0)
                lg = jnp.where(row < valid_rows, lg, 0.0)   # select discards NaN/-inf
            acc_ref[...] += jnp.sum(lg.reshape(groups, _SUBLANES, _LANES), axis=0)

        full_end = last_blk if has_tail else num_blocks

        @pl.when(blk < full_end)
        def _():
            accumulate(block_rows)

        if has_tail:
            @pl.when(blk == last_blk)
            def _():
                accumulate(tail_rows)

        @pl.when(i == steps - 1)
        def _():
            out_ref[0, 0] = jnp.sum(acc_ref[...])

    return kernel


# ---------------------------------------------------------------------------
# Wrappers
# ---------------------------------------------------------------------------
def _sse_sums(x_hat, target):
    """Returns (sum((x_hat-target)^2), sum((clamp(x_hat,0,1)-target)^2))."""
    xh = _to_slab(x_hat, 0.0)     # neutral pad: 0 - 0 = 0 contributes nothing
    tg = _to_slab(target, 0.0)
    rows = xh.shape[0]
    block_rows, num_blocks, ncores, steps = _plan(rows)
    last_blk = num_blocks - 1

    def in_map(c, i):
        # Clamp logically out-of-range blocks onto the last real block; their
        # compute is skipped in-kernel via pl.when.
        return (jnp.minimum(c * steps + i, last_blk), 0)

    bytes_accessed = xh.size * xh.dtype.itemsize + tg.size * tg.dtype.itemsize

    sse, csse = pl.pallas_call(
        _make_sse_kernel(rows, block_rows, steps),
        out_shape=(
            jax.ShapeDtypeStruct((ncores, 1), jnp.float32),
            jax.ShapeDtypeStruct((ncores, 1), jnp.float32),
        ),
        grid_spec=pltpu.PrefetchScalarGridSpec(
            num_scalar_prefetch=0,
            grid=(ncores, steps),
            in_specs=[
                pl.BlockSpec((block_rows, _LANES), in_map),
                pl.BlockSpec((block_rows, _LANES), in_map),
            ],
            out_specs=(_scalar_out_spec(), _scalar_out_spec()),
            scratch_shapes=[
                pltpu.VMEM((_SUBLANES, _LANES), jnp.float32),   # one vreg
                pltpu.VMEM((_SUBLANES, _LANES), jnp.float32),   # one vreg
            ],
        ),
        compiler_params=pltpu.CompilerParams(
            dimension_semantics=("parallel", "arbitrary"),
            vmem_limit_bytes=_VMEM_LIMIT_BYTES,
        ),
        cost_estimate=pl.CostEstimate(
            flops=6 * xh.size, transcendentals=0, bytes_accessed=bytes_accessed
        ),
    )(xh, tg)
    return jnp.sum(sse), jnp.sum(csse)


def _log_sum(likelihoods):
    """Returns sum(log(x)) over one likelihood tensor (any shape/dtype)."""
    if likelihoods.size == 0:
        return jnp.float32(0.0)
    lk = _to_slab(likelihoods, 1.0)   # neutral pad: log(1) = 0
    rows = lk.shape[0]
    block_rows, num_blocks, ncores, steps = _plan(rows)
    last_blk = num_blocks - 1

    def in_map(c, i):
        return (jnp.minimum(c * steps + i, last_blk), 0)

    out = pl.pallas_call(
        _make_logsum_kernel(rows, block_rows, steps),
        out_shape=jax.ShapeDtypeStruct((ncores, 1), jnp.float32),
        grid_spec=pltpu.PrefetchScalarGridSpec(
            num_scalar_prefetch=0,
            grid=(ncores, steps),
            in_specs=[pl.BlockSpec((block_rows, _LANES), in_map)],
            out_specs=_scalar_out_spec(),
            scratch_shapes=[pltpu.VMEM((_SUBLANES, _LANES), jnp.float32)],
        ),
        compiler_params=pltpu.CompilerParams(
            dimension_semantics=("parallel", "arbitrary"),
            vmem_limit_bytes=_VMEM_LIMIT_BYTES,
        ),
        cost_estimate=pl.CostEstimate(
            flops=2 * lk.size,
            transcendentals=lk.size,
            bytes_accessed=lk.size * lk.dtype.itemsize,
        ),
    )(lk)
    return jnp.sum(out)


def rate_distortion_loss(output, target, lmbda=0.01):
    """JAX/Pallas equivalent of RateDistortionLoss.forward.

    output: dict with 'x_hat' (N,C,H,W) and 'likelihoods' (dict of arrays).
    target: (N,C,H,W).
    """
    N, _, H, W = target.shape
    num_pixels = N * H * W
    total_elems = target.size     # MSELoss mean is over all elements

    # One log-sum launch per likelihood tensor (no wrapper-side concat/cast,
    # no extra HBM pass); matches the per-tensor sum of the PyTorch module.
    lks = list(output["likelihoods"].values())
    if lks:
        bpp_loss = sum(
            _log_sum(v) / (-math.log(2) * num_pixels) for v in lks
        )
    else:
        bpp_loss = jnp.float32(0.0)

    sse, csse = _sse_sums(output["x_hat"], target)
    mse_loss = sse / jnp.float32(total_elems)
    rdloss = lmbda * (255.0 ** 2) * mse_loss + bpp_loss

    # psnr on clamp(x_hat, 0, 1); returns 100 if mse == 0
    mse_c = csse / jnp.float32(total_elems)
    psnr = jnp.where(
        mse_c == 0.0,
        jnp.float32(100.0),
        10.0 * jnp.log10(1.0 / mse_c),
    )

    return {
        "bpp_loss": bpp_loss,
        "mse_loss": mse_loss,
        "rdloss": rdloss,
        "psnr": psnr,
    }


# ---------------------------------------------------------------------------
# Example / self-check
# ---------------------------------------------------------------------------
if __name__ == "__main__":
    key = jax.random.PRNGKey(0)
    k1, k2, k3, k4, k5, k6, k7 = jax.random.split(key, 7)

    # --- RateDistortionLoss on module-typical small shapes ---
    N, C, H, W = 2, 4, 16, 16
    target = jax.random.uniform(k1, (N, C, H, W), dtype=jnp.float32)
    x_hat = target + 0.05 * jax.random.normal(k2, (N, C, H, W), dtype=jnp.float32)

    # synthetic likelihoods in (0, 1), shapes typical of a hyperprior codec
    lk_y = jax.nn.sigmoid(jax.random.normal(k3, (N, 8, 4, 4), dtype=jnp.float32))
    lk_z = jax.nn.sigmoid(jax.random.normal(k4, (N, 4, 2, 2), dtype=jnp.float32))

    output = {"x_hat": x_hat, "likelihoods": {"y": lk_y, "z": lk_z}}

    out = rate_distortion_loss(output, target, lmbda=0.01)
    out = jax.tree_util.tree_map(jax.block_until_ready, out)

    # pure-JAX reference
    ref_mse = jnp.mean((x_hat - target) ** 2)
    ref_bpp = (jnp.sum(jnp.log(lk_y)) + jnp.sum(jnp.log(lk_z))) / (
        -math.log(2) * N * H * W
    )
    ref_rd = 0.01 * 255.0 ** 2 * ref_mse + ref_bpp
    ref_psnr = 10.0 * jnp.log10(1.0 / jnp.mean((jnp.clip(x_hat, 0, 1) - target) ** 2))

    assert jnp.allclose(out["mse_loss"], ref_mse, rtol=1e-5, atol=1e-6)
    assert jnp.allclose(out["bpp_loss"], ref_bpp, rtol=1e-5, atol=1e-6)
    assert jnp.allclose(out["rdloss"], ref_rd, rtol=1e-5, atol=1e-5)
    assert jnp.allclose(out["psnr"], ref_psnr, rtol=1e-5, atol=1e-5)

    # --- larger check: exercises multi-block grid, 2-core axis, duplicate-
    #     block skip, ragged-tail mask and the non-multiple-of-1024 pad path ---
    n_big = 9000 * _LANES - 100   # -> rows=9000: 3 blocks of 4096 rows, ragged tail
    a = jax.random.uniform(k5, (n_big,), dtype=jnp.float32)
    b = a + 0.05 * jax.random.normal(k6, (n_big,), dtype=jnp.float32)
    u = jax.random.uniform(k7, (n_big,), minval=0.05, maxval=1.0, dtype=jnp.float32)

    sse_big, csse_big = _sse_sums(b, a)
    ls_big = _log_sum(u)
    jax.block_until_ready((sse_big, csse_big, ls_big))

    assert jnp.allclose(sse_big, jnp.sum((b - a) ** 2), rtol=1e-4)
    assert jnp.allclose(csse_big, jnp.sum((jnp.clip(b, 0.0, 1.0) - a) ** 2), rtol=1e-4)
    assert jnp.allclose(ls_big, jnp.sum(jnp.log(u)), rtol=1e-4)

    print("KERNEL_OK")
</pallas_src>

<mosaic_0001>
module attributes {stable_mosaic.version = 11 : i64} {
  func.func @kernel(%arg0: i32, %arg1: i32, %arg2: memref<8x128xf32, #tpu.memory_space<vmem>>, %arg3: memref<1x1xf32, #tpu.memory_space<smem>>, %arg4: memref<8x128xf32, #tpu.memory_space<vmem>>) attributes {dimension_semantics = [#tpu.dimension_semantics<parallel>, #tpu.dimension_semantics<arbitrary>], iteration_bounds = array<i64: 1, 1>, scalar_prefetch = 0 : i64, scratch_operands = 1 : i64, tpu.core_type = #tpu.core_type<tc>, window_params = [{transform_indices = @transform_0, window_bounds = array<i64: 8, 128>}, {transform_indices = @transform_1, window_bounds = array<i64: 1, 1>}]} {
    %c1_i32 = arith.constant 1 : i32
    %0 = arith.muli %arg0, %c1_i32 : i32
    %1 = arith.addi %0, %arg1 : i32
    %c0_i32 = arith.constant 0 : i32
    %2 = arith.cmpi eq, %arg1, %c0_i32 : i32
    %3 = arith.extui %2 : i1 to i32
    %c0_i32_0 = arith.constant 0 : i32
    %4 = arith.cmpi ne, %3, %c0_i32_0 : i32
    scf.if %4 {
      %cst = arith.constant 0.000000e+00 : f32
      %11 = vector.broadcast %cst : f32 to vector<8x128xf32>
      %c0 = arith.constant 0 : index
      %c0_5 = arith.constant 0 : index
      %12 = vector.load %arg4[%c0, %c0_5] : memref<8x128xf32, #tpu.memory_space<vmem>>, vector<8x128xf32>
      tpu.vector_store %arg4[%c0, %c0_5], %11 {strides = array<i32>} : memref<8x128xf32, #tpu.memory_space<vmem>>, vector<8x128xf32>,
    } else {
    }
    %c1_i32_1 = arith.constant 1 : i32
    %5 = arith.cmpi slt, %1, %c1_i32_1 : i32
    %6 = arith.extui %5 : i1 to i32
    %c0_i32_2 = arith.constant 0 : i32
    %7 = arith.cmpi ne, %6, %c0_i32_2 : i32
    scf.if %7 {
      %c0 = arith.constant 0 : index
      %c0_5 = arith.constant 0 : index
      %11 = vector.load %arg2[%c0, %c0_5] : memref<8x128xf32, #tpu.memory_space<vmem>>, vector<8x128xf32>
      %12 = math.log %11 : vector<8x128xf32>
      %c0_6 = arith.constant 0 : index
      %c0_7 = arith.constant 0 : index
      %13 = vector.load %arg4[%c0_6, %c0_7] : memref<8x128xf32, #tpu.memory_space<vmem>>, vector<8x128xf32>
      %14 = vector.shape_cast %12 : vector<8x128xf32> to vector<1x8x128xf32>
      %cst = arith.constant dense<0.000000e+00> : vector<8x128xf32>
      %15 = vector.multi_reduction <add>, %14, %cst [0] : vector<1x8x128xf32> to vector<8x128xf32>
      %16 = arith.addf %13, %15 : vector<8x128xf32>
      %c0_8 = arith.constant 0 : index
      %c0_9 = arith.constant 0 : index
      %17 = vector.load %arg4[%c0_8, %c0_9] : memref<8x128xf32, #tpu.memory_space<vmem>>, vector<8x128xf32>
      tpu.vector_store %arg4[%c0_8, %c0_9], %16 {strides = array<i32>} : memref<8x128xf32, #tpu.memory_space<vmem>>, vector<8x128xf32>,
    } else {
    }
    %c0_i32_3 = arith.constant 0 : i32
    %8 = arith.cmpi eq, %arg1, %c0_i32_3 : i32
    %9 = arith.extui %8 : i1 to i32
    %c0_i32_4 = arith.constant 0 : i32
    %10 = arith.cmpi ne, %9, %c0_i32_4 : i32
    scf.if %10 {
      %c0 = arith.constant 0 : index
      %c0_5 = arith.constant 0 : index
      %11 = vector.load %arg4[%c0, %c0_5] : memref<8x128xf32, #tpu.memory_space<vmem>>, vector<8x128xf32>
      %12 = vector.shape_cast %11 : vector<8x128xf32> to vector<1x8x128xf32>
      %cst = arith.constant dense<0.000000e+00> : vector<1xf32>
      %13 = vector.multi_reduction <add>, %12, %cst [1, 2] : vector<1x8x128xf32> to vector<1xf32>
      %14 = vector.shape_cast %13 : vector<1xf32> to vector<1x1x1xf32>
      %15 = vector.extract %14[0, 0, 0] : f32 from vector<1x1x1xf32>
      %c0_6 = arith.constant 0 : index
      %c0_7 = arith.constant 0 : index
      %16 = memref.load %arg3[%c0_6, %c0_7] : memref<1x1xf32, #tpu.memory_space<smem>>
      memref.store %15, %arg3[%c0_6, %c0_7] : memref<1x1xf32, #tpu.memory_space<smem>>
    } else {
    }
    return
  }
  func.func @transform_0(%arg0: i32, %arg1: i32) -> (i32, i32) {
    %c1_i32 = arith.constant 1 : i32
    %0 = arith.muli %arg0, %c1_i32 : i32
    %1 = arith.addi %0, %arg1 : i32
    %c0_i32 = arith.constant 0 : i32
    %2 = arith.minsi %1, %c0_i32 : i32
    %c0_i32_0 = arith.constant 0 : i32
    %c0_i32_1 = arith.constant 0 : i32
    return %2, %c0_i32_0 : i32, i32
  }
  func.func @transform_1(%arg0: i32, %arg1: i32) -> (i32, i32) {
    %c0_i32 = arith.constant 0 : i32
    %c0_i32_0 = arith.constant 0 : i32
    return %arg0, %c0_i32 : i32, i32
  }
}

</mosaic_0001>

<bundles_post_ra>
// kernel: tpu_custom_call.1
= control target key start
LH: loop header
LB: loop body
LE: loop exit
PB: predicated region body
PF: predicated region fallthrough
CT: control target
= control target key end

     0   :  { %6 = vsyncpa [#allocation4], 0  ;;  %s155_s0 = inlined_call_operand.hbm [shape: f32[8,128], index: 0, kind: input, shape index: {}]   ;;  %s156_s1 = inlined_call_operand.hbm [shape: f32[1,1], index: 1, kind: output, shape index: {}]  }
   0x1   :  { %7 = vsyncpa [#allocation5], 0  ;;  %s119_s6 = smov [#allocation3]   ;;  %s83_s10 = scalar_lea.hbm %s155_s0, 128 }
   0x2   :  { %s19_s7 = sshll.u32 %s119_s6, 4  ;;  %p84_p0 = scmp.ne.s32.totalorder %s155_s0, %s83_s10  ;;  %s20_s7 = int_to_ptr.vmem [resolvable:$true] %s19_s7 }
   0x3   :  { %p87_p1 = scmp.lt.u32.totalorder %s83_s10, %s155_s0 }
   0x5   :  { %p89_p2 = pnand %p87_p1, %p84_p0 }
   0x7   :  { %92 = shalt.err (!%p89_p2)
}
   0x8   :  { %s93_s15 = scalar_lea.vmem %s20_s7, 128  ;;  %p98_p4 = scmp.lt.s32.totalorder %s20_s7, %s20_s7 }
   0x9   :  { %p94_p3 = scmp.ne.s32.totalorder %s20_s7, %s93_s15  ;;  %p99_p5 = scmp.lt.s32.totalorder %s93_s15, %s93_s15 }
   0xb   :  { %p100_p6 = por %p99_p5, %p98_p4 }
   0xd   :  { %p101_p7 = pnand %p100_p6, %p94_p3 }
   0xf   :  { %104 = shalt.err (!%p101_p7)
}
  0x10   :  { %22 = dma.hbm_to_vmem [thread:$0]  %s155_s0, 128, %s20_s7, [#allocation4]  }
  0x11   :  { %115 = dma.done.wait [#allocation4], 128  }
  0x12   :  { %116 = vsyncadd [#allocation4], 4294967168  ;;  %v39_v0 = vld [vmem:[#allocation3] sm:$0xff]  ;;  %s105_s0 = scalar_lea.hbm %s156_s1, 16 }
  0x13   :  { %81 = vlog2.f32 %v39_v0  ;;  %p106_p8 = scmp.ne.s32.totalorder %s156_s1, %s105_s0  ;;  %p109_p9 = scmp.lt.u32.totalorder %s105_s0, %s156_s1 }
  0x15   :  { %p111_p10 = pnand %p109_p9, %p106_p8 }
  0x1d   :  { %v82_v1 = vpop.eup %81 }
  0x1e   :  { %v41_v2 = vmul.f32 0.6931472, %v82_v1 }
  0x20   :  { %50 = vadd.xlane.f32.xlu0 %v41_v2 }
  0xad   :  { %v51_v3 = vpop.xlane.xlu0 %50 }
  0xae   :  { %v52_v4 = vrot.slane %v51_v3, 4 }
  0xb0   :  { %v53_v5 = vadd.f32 %v52_v4, %v51_v3 }
  0xb2   :  { %v54_v6 = vrot.slane %v53_v5, 2 }
  0xb4   :  { %v55_v7 = vadd.f32 %v54_v6, %v53_v5 }
  0xb6   :  { %v56_v8 = vrot.slane %v55_v7, 1 }
  0xb8   :  { %v57_v9 = vadd.f32 %v56_v8, %v55_v7 }
  0xba   :  { %77 = vpush %v57_v9 }
  0xeb   :  { %s78_s18 = spop %77 }
  0xec   :  { %60 = sst [smem:[#allocation6]] %s78_s18 }
  0xed   :  { %114 = shalt.err (!%p111_p10)
}
  0xee   :  { %s120_s25 = smov [#allocation6]  }
  0xef   :  { %68 = dma.smem_to_hbm %s120_s25, 16, %s156_s1, [#allocation5]  }
  0xf0   :  { %117 = dma.done.wait [#allocation5], 16  }
  0xf1   :  { %118 = vsyncadd [#allocation5], 4294967280 }
  0xf2   :  { %72 = sfence }
  0xf3   :  { %73 = vsyncpa [#allocation4], 1 }
  0xf4   :  { %74 = vsyncpa [#allocation5], 1 }

</bundles_post_ra>
